<compile_context>
chip_gen: v6e
topology: v6e:2x2x1
jax: 0.10.0
libtpu: 0.0.40
codegen_flags: <defaults>
</compile_context>

<pallas_src>
import functools

import jax
import jax.numpy as jnp
from jax.experimental import pallas as pl
from jax.experimental.pallas import tpu as pltpu

GAMMA = 0.0
ALPHA = 0.5
SIZE_AVERAGE = True

_LANES = 128
_MAX_TILE_ROWS = 2048  # 2048 x 128 f32 = 1 MiB per input block


def _round_up(x, m):
    return ((x + m - 1) // m) * m


def _focal_loss_partial_kernel(p_ref, t_ref, out_ref, *, alpha, gamma,
                               total_rows, tile_rows):
    """Per-block partial focal-loss sum, written as an (8, 128) slab."""
    i = pl.program_id(0)

    # Mask rows past the end of the (unpadded) array: boundary blocks of the
    # grid read garbage there.  Masked lanes get p=0, t=0 -> pt=1 -> loss=0.
    row_ids = i * tile_rows + jax.lax.broadcasted_iota(
        jnp.int32, (tile_rows, _LANES), 0)
    valid = row_ids < total_rows

    p = jnp.where(valid, p_ref[...], 0.0)                       # f32
    t = jnp.where(valid, t_ref[...].astype(jnp.float32), 0.0)   # {0,1} -> f32

    # weights = alphas.gather(0, target) == (1-alpha) if t==0 else alpha
    w = (1.0 - alpha) + (2.0 * alpha - 1.0) * t
    # pt = 1 - t + (2t - 1) * p  ==  p if t==1 else (1 - p)
    pt = 1.0 - t + (2.0 * t - 1.0) * p
    logpt = jnp.log(pt) * w

    if gamma == 0.0:
        # (1 - pt)**0 == 1 in the reference; skip the pow entirely.
        loss = -logpt
    else:
        # (1-pt)^gamma via exp(gamma*log(1-pt)), guarded so 1-pt==0 -> 0.
        one_m_pt = 1.0 - pt
        safe = jnp.where(one_m_pt > 0.0, one_m_pt, 1.0)
        pow_term = jnp.where(one_m_pt > 0.0,
                             jnp.exp(gamma * jnp.log(safe)), 0.0)
        loss = -pow_term * logpt

    # Reduce (tile_rows, 128) -> (8, 128) with vreg-wise VPU adds only;
    # the final cross-lane/sublane reduce happens outside the kernel.
    out_ref[0] = jnp.sum(loss.reshape(tile_rows // 8, 8, _LANES), axis=0)


def focal_loss_one_channel(inp, target, *, gamma=GAMMA, alpha=ALPHA,
                           size_average=SIZE_AVERAGE):
    """inp: (n,1,h,w) float probabilities, target: (n,h,w) in {0,1}."""
    p_flat = inp.reshape(-1)
    if p_flat.dtype != jnp.float32:
        p_flat = p_flat.astype(jnp.float32)
    t_flat = target.reshape(-1)
    if t_flat.dtype != jnp.int8:
        # {0,1} is exact in int8; keeps kernel HBM traffic minimal.
        t_flat = t_flat.astype(jnp.int8)

    n_elems = p_flat.shape[0]

    # Rows of 128 lanes needed to hold the data.
    n_lane = _round_up(n_elems, _LANES)
    rows = n_lane // _LANES

    # Tile: big for large inputs, exact cover (multiple of 32 sublanes for the
    # int8 operand) for small ones.
    tile_rows = min(_MAX_TILE_ROWS, _round_up(rows, 32))

    if rows < tile_rows:
        n_padded = tile_rows * _LANES     # tiny input: one full block
    else:
        n_padded = n_lane                 # only lane-align the ragged tail
    if n_padded != n_elems:
        # TODO(synk): for huge lane-misaligned inputs this pad still copies the
        # whole array; an in-kernel lane mask on the last row would avoid it.
        pad = n_padded - n_elems
        p_flat = jnp.pad(p_flat, (0, pad))   # p=0, t=0 -> zero loss contribution
        t_flat = jnp.pad(t_flat, (0, pad))

    rows_padded = n_padded // _LANES
    p2d = p_flat.reshape(rows_padded, _LANES)
    t2d = t_flat.reshape(rows_padded, _LANES)

    num_blocks = pl.cdiv(rows_padded, tile_rows)

    kernel = functools.partial(_focal_loss_partial_kernel,
                               alpha=float(alpha), gamma=float(gamma),
                               total_rows=rows_padded, tile_rows=tile_rows)

    partials = pl.pallas_call(
        kernel,
        out_shape=jax.ShapeDtypeStruct((num_blocks, 8, _LANES), jnp.float32),
        grid_spec=pltpu.PrefetchScalarGridSpec(
            num_scalar_prefetch=0,
            grid=(num_blocks,),
            in_specs=[
                pl.BlockSpec((tile_rows, _LANES), lambda i: (i, 0)),
                pl.BlockSpec((tile_rows, _LANES), lambda i: (i, 0)),
            ],
            out_specs=pl.BlockSpec((1, 8, _LANES), lambda i: (i, 0, 0)),
        ),
        compiler_params=pltpu.CompilerParams(
            dimension_semantics=("parallel",)),
    )(p2d, t2d)

    total = jnp.sum(partials)
    if size_average:
        return total / jnp.float32(n_elems)
    return total


def _reference(inp, target, *, gamma=GAMMA, alpha=ALPHA,
               size_average=SIZE_AVERAGE):
    p = inp.reshape(-1).astype(jnp.float32)
    t = target.reshape(-1).astype(jnp.float32)
    w = jnp.where(t > 0.5, alpha, 1.0 - alpha)
    pt = 1.0 - t + (2.0 * t - 1.0) * p
    logpt = jnp.log(pt) * w
    if gamma == 0.0:
        loss = -logpt
    else:
        loss = -jnp.power(1.0 - pt, gamma) * logpt
    return loss.mean() if size_average else loss.sum()


if __name__ == "__main__":
    key = jax.random.PRNGKey(0)
    k1, k2, k3, k4 = jax.random.split(key, 4)

    # Small case matching the module's expected layout: input (n,1,h,w), target (n,h,w).
    n, h, w = 2, 16, 16
    x = jax.random.uniform(k1, (n, 1, h, w), jnp.float32, 0.05, 0.95)
    tgt = jax.random.bernoulli(k2, 0.5, (n, h, w)).astype(jnp.int8)
    out = jax.block_until_ready(focal_loss_one_channel(x, tgt))
    ref = _reference(x, tgt)
    assert jnp.allclose(out, ref, rtol=1e-4, atol=1e-6), (out, ref)

    # Larger multi-block case exercising the boundary-block / row-mask path.
    n2, h2, w2 = 1, 640, 512
    x2 = jax.random.uniform(k3, (n2, 1, h2, w2), jnp.float32, 0.05, 0.95)
    tgt2 = jax.random.bernoulli(k4, 0.5, (n2, h2, w2)).astype(jnp.int8)
    out2 = jax.block_until_ready(focal_loss_one_channel(x2, tgt2))
    ref2 = _reference(x2, tgt2)
    assert jnp.allclose(out2, ref2, rtol=1e-4, atol=1e-6), (out2, ref2)

    print("KERNEL_OK")
</pallas_src>

<mosaic_0001>
module attributes {stable_mosaic.version = 11 : i64} {
  func.func @_focal_loss_partial_kernel(%arg0: i32, %arg1: memref<32x128xf32, #tpu.memory_space<vmem>>, %arg2: memref<32x128xi8, #tpu.memory_space<vmem>>, %arg3: memref<1x8x128xf32, #tpu.memory_space<vmem>>) attributes {dimension_semantics = [#tpu.dimension_semantics<parallel>], iteration_bounds = array<i64: 1>, scalar_prefetch = 0 : i64, scratch_operands = 0 : i64, tpu.core_type = #tpu.core_type<tc>, window_params = [{transform_indices = @transform_0, window_bounds = array<i64: 32, 128>}, {transform_indices = @transform_1, window_bounds = array<i64: 32, 128>}, {transform_indices = @transform_2, window_bounds = array<i64: 1, 8, 128>}]} {
    %c32_i32 = arith.constant 32 : i32
    %0 = arith.muli %arg0, %c32_i32 : i32
    %1 = tpu.iota {dimensions = array<i32: 0>} : vector<32x128xi32>
    %2 = vector.broadcast %0 : i32 to vector<32x128xi32>
    %3 = arith.addi %2, %1 : vector<32x128xi32>
    %c32_i32_0 = arith.constant 32 : i32
    %4 = vector.broadcast %c32_i32_0 : i32 to vector<32x128xi32>
    %5 = arith.cmpi slt, %3, %4 : vector<32x128xi32>
    %c0 = arith.constant 0 : index
    %c0_1 = arith.constant 0 : index
    %6 = vector.load %arg1[%c0, %c0_1] : memref<32x128xf32, #tpu.memory_space<vmem>>, vector<32x128xf32>
    %cst = arith.constant 0.000000e+00 : f32
    %7 = vector.broadcast %cst : f32 to vector<32x128xf32>
    %8 = arith.select %5, %6, %7 : vector<32x128xi1>, vector<32x128xf32>
    %c0_2 = arith.constant 0 : index
    %c0_3 = arith.constant 0 : index
    %9 = vector.load %arg2[%c0_2, %c0_3] : memref<32x128xi8, #tpu.memory_space<vmem>>, vector<32x128xi8>
    %10 = arith.sitofp %9 : vector<32x128xi8> to vector<32x128xf32>
    %cst_4 = arith.constant 0.000000e+00 : f32
    %11 = vector.broadcast %cst_4 : f32 to vector<32x128xf32>
    %12 = arith.select %5, %10, %11 : vector<32x128xi1>, vector<32x128xf32>
    %cst_5 = arith.constant 0.000000e+00 : f32
    %13 = vector.broadcast %cst_5 : f32 to vector<32x128xf32>
    %14 = arith.mulf %13, %12 : vector<32x128xf32>
    %cst_6 = arith.constant 5.000000e-01 : f32
    %15 = vector.broadcast %cst_6 : f32 to vector<32x128xf32>
    %16 = arith.addf %15, %14 : vector<32x128xf32>
    %cst_7 = arith.constant 1.000000e+00 : f32
    %17 = vector.broadcast %cst_7 : f32 to vector<32x128xf32>
    %18 = arith.subf %17, %12 : vector<32x128xf32>
    %cst_8 = arith.constant 2.000000e+00 : f32
    %19 = vector.broadcast %cst_8 : f32 to vector<32x128xf32>
    %20 = arith.mulf %19, %12 : vector<32x128xf32>
    %cst_9 = arith.constant 1.000000e+00 : f32
    %21 = vector.broadcast %cst_9 : f32 to vector<32x128xf32>
    %22 = arith.subf %20, %21 : vector<32x128xf32>
    %23 = arith.mulf %22, %8 : vector<32x128xf32>
    %24 = arith.addf %18, %23 : vector<32x128xf32>
    %25 = math.log %24 : vector<32x128xf32>
    %26 = arith.mulf %25, %16 : vector<32x128xf32>
    %cst_10 = arith.constant 0.000000e+00 : f32
    %27 = vector.broadcast %cst_10 : f32 to vector<32x128xf32>
    %28 = arith.subf %27, %26 : vector<32x128xf32>
    %29 = vector.shape_cast %28 : vector<32x128xf32> to vector<4x8x128xf32>
    %cst_11 = arith.constant dense<0.000000e+00> : vector<8x128xf32>
    %30 = vector.multi_reduction <add>, %29, %cst_11 [0] : vector<4x8x128xf32> to vector<8x128xf32>
    %c0_12 = arith.constant 0 : index
    %c0_13 = arith.constant 0 : index
    %c0_14 = arith.constant 0 : index
    %31 = vector.load %arg3[%c0_12, %c0_13, %c0_14] : memref<1x8x128xf32, #tpu.memory_space<vmem>>, vector<1x8x128xf32>
    %32 = vector.shape_cast %31 : vector<1x8x128xf32> to vector<8x128xf32>
    %33 = vector.shape_cast %30 : vector<8x128xf32> to vector<1x8x128xf32>
    tpu.vector_store %arg3[%c0_12, %c0_13, %c0_14], %33 {strides = array<i32>} : memref<1x8x128xf32, #tpu.memory_space<vmem>>, vector<1x8x128xf32>,
    return
  }
  func.func @transform_0(%arg0: i32) -> (i32, i32) {
    %c0_i32 = arith.constant 0 : i32
    %c0_i32_0 = arith.constant 0 : i32
    return %arg0, %c0_i32 : i32, i32
  }
  func.func @transform_1(%arg0: i32) -> (i32, i32) {
    %c0_i32 = arith.constant 0 : i32
    %c0_i32_0 = arith.constant 0 : i32
    return %arg0, %c0_i32 : i32, i32
  }
  func.func @transform_2(%arg0: i32) -> (i32, i32, i32) {
    %c0_i32 = arith.constant 0 : i32
    %c0_i32_0 = arith.constant 0 : i32
    %c0_i32_1 = arith.constant 0 : i32
    return %arg0, %c0_i32, %c0_i32_0 : i32, i32, i32
  }
}

</mosaic_0001>

<bundles_post_ra>
// kernel: tpu_custom_call.1
= control target key start
LH: loop header
LB: loop body
LE: loop exit
PB: predicated region body
PF: predicated region fallthrough
CT: control target
= control target key end

     0   :  { %7 = vsyncpa [#allocation3], 0  ;;  %s250_s0 = inlined_call_operand.hbm [shape: f32[32,128], index: 0, kind: input, shape index: {}]   ;;  %s251_s1 = inlined_call_operand.hbm [shape: s8[32,128], index: 1, kind: input, shape index: {}]   ;;  %s252_s2 = inlined_call_operand.hbm [shape: f32[1,8,128], index: 2, kind: output, shape index: {}]  }
   0x1   :  { %8 = vsyncpa [#allocation6], 0 }
   0x2   :  { %9 = vsyncpa [#allocation4], 0  ;;  %s221_s9 = smov [#allocation2]  }
   0x3   :  { %s15_s10 = sshll.u32 %s221_s9, 4  ;;  %s16_s10 = int_to_ptr.vmem [resolvable:$true] %s15_s10 }
   0x4   :  { %s163_s11 = scalar_lea.vmem %s16_s10, 512  ;;  %p168_p1 = scmp.lt.s32.totalorder %s16_s10, %s16_s10 }
   0x5   :  { %p164_p0 = scmp.ne.s32.totalorder %s16_s10, %s163_s11  ;;  %p169_p2 = scmp.lt.s32.totalorder %s163_s11, %s163_s11 }
   0x7   :  { %p170_p3 = por %p169_p2, %p168_p1 }
   0x9   :  { %p171_p4 = pnand %p170_p3, %p164_p0 }
   0xb   :  { %174 = shalt.err (!%p171_p4)
}
   0xc   :  { %s222_s12 = smov 128   ;;  %s223_s13 = smov 8  }
   0xd   :  { %21 = dma.hbm_to_vmem [thread:$0]  %s250_s0, 512, %s16_s10, [#allocation3], %s222_s12, %s222_s12, %s223_s13  }
   0xe   :  { %s224_s16 = smov [#allocation5]  }
   0xf   :  { %s28_s17 = sshll.u32 %s224_s16, 4  ;;  %s29_s17 = int_to_ptr.vmem [resolvable:$true] %s28_s17 }
  0x10   :  { %s183_s18 = scalar_lea.vmem %s29_s17, 128  ;;  %p188_p6 = scmp.lt.s32.totalorder %s29_s17, %s29_s17 }
  0x11   :  { %p184_p5 = scmp.ne.s32.totalorder %s29_s17, %s183_s18  ;;  %p189_p7 = scmp.lt.s32.totalorder %s183_s18, %s183_s18 }
  0x13   :  { %p190_p8 = por %p189_p7, %p188_p6 }
  0x15   :  { %p191_p9 = pnand %p190_p8, %p184_p5 }
  0x17   :  { %194 = shalt.err (!%p191_p9)
}
  0x18   :  { %31 = dma.hbm_to_vmem [thread:$0]  %s251_s1, 128, %s29_s17, [#allocation6]  }
  0x19   :  { %215 = dma.done.wait [#allocation3], 512  }
  0x1a   :  { %216 = vsyncadd [#allocation3], 4294966784 }
  0x1b   :  { %217 = dma.done.wait [#allocation6], 128  }
  0x1c   :  { %218 = vsyncadd [#allocation6], 4294967168  ;;  %v61_v0 = vld [vmem:[#allocation5] sm:$0xff]  ;;  %v54_v14 = vld [vmem:[#allocation2 + $0x8] sm:$0xff]  ;;  %s225_s0 = smov [#allocation7]  }
  0x1d   :  { %v62_v1 = vunpack.c.0.s8 %v61_v0  ;;  %v63_v2 = vunpack.c.1.s8 %v61_v0  ;;  %v64_v3 = vunpack.c.2.s8 %v61_v0  ;;  %v65_v4 = vunpack.c.3.s8 %v61_v0  ;;  %v53_v9 = vld [vmem:[#allocation2] sm:$0xff]  ;;  %v55_v15 = vld [vmem:[#allocation2 + $0x10] sm:$0xff]  ;;  %v56_v16 = vld [vmem:[#allocation2 + $0x18] sm:$0xff]  ;;  %s128_s1 = sshll.u32 %s225_s0, 4  ;;  %s129_s1 = int_to_ptr.vmem [resolvable:$true] %s128_s1 }
  0x1e   :  { %s195_s21 = scalar_lea.vmem %s129_s1, 128  ;;  %p200_p11 = scmp.lt.s32.totalorder %s129_s1, %s129_s1 }
  0x1f   :  { %v66_v5 = vcvt.s32.f32 %v62_v1  ;;  %v67_v6 = vcvt.s32.f32 %v63_v2  ;;  %v68_v7 = vcvt.s32.f32 %v64_v3  ;;  %v69_v8 = vcvt.s32.f32 %v65_v4  ;;  %p196_p10 = scmp.ne.s32.totalorder %s129_s1, %s195_s21  ;;  %p201_p12 = scmp.lt.s32.totalorder %s195_s21, %s195_s21 }
  0x21   :  { %v86_v10 = vmul.f32 2.0, %v66_v5  ;;  %v87_v11 = vmul.f32 2.0, %v67_v6  ;;  %v88_v12 = vmul.f32 2.0, %v68_v7  ;;  %v89_v13 = vmul.f32 2.0, %v69_v8  ;;  %p202_p13 = por %p201_p12, %p200_p11 }
  0x22   :  { %v82_v17 = vsub.f32 1.0, %v66_v5  ;;  %v83_v18 = vsub.f32 1.0, %v67_v6  ;;  %v84_v19 = vsub.f32 1.0, %v68_v7  ;;  %v85_v24 = vsub.f32 1.0, %v69_v8 }
  0x23   :  { %v138_v20 = vadd.f32 -1.0, %v86_v10  ;;  %v139_v21 = vadd.f32 -1.0, %v87_v11  ;;  %v140_v22 = vadd.f32 -1.0, %v88_v12  ;;  %v141_v23 = vadd.f32 -1.0, %v89_v13  ;;  %p203_p0 = pnand %p202_p13, %p196_p10 }
  0x24   :  { %v74_v33 = vmul.f32 0.0, %v66_v5  ;;  %v75_v34 = vmul.f32 0.0, %v67_v6  ;;  %v76_v35 = vmul.f32 0.0, %v68_v7  ;;  %v77_v36 = vmul.f32 0.0, %v69_v8 }
  0x25   :  { %v94_v25 = vmul.f32 %v138_v20, %v53_v9  ;;  %v95_v26 = vmul.f32 %v139_v21, %v54_v14  ;;  %v96_v27 = vmul.f32 %v140_v22, %v55_v15  ;;  %v97_v28 = vmul.f32 %v141_v23, %v56_v16 }
  0x26   :  { %v78_v37 = vadd.f32 0.5, %v74_v33  ;;  %v79_v39 = vadd.f32 0.5, %v75_v34  ;;  %v80_v41 = vadd.f32 0.5, %v76_v35  ;;  %v81_v44 = vadd.f32 0.5, %v77_v36 }
  0x27   :  { %v98_v29 = vadd.f32 %v94_v25, %v82_v17  ;;  %v99_v30 = vadd.f32 %v95_v26, %v83_v18  ;;  %v100_v31 = vadd.f32 %v96_v27, %v84_v19  ;;  %v101_v32 = vadd.f32 %v97_v28, %v85_v24 }
  0x29   :  { %147 = vlog2.f32 %v98_v29 }
  0x2a   :  { %149 = vlog2.f32 %v99_v30 }
  0x2b   :  { %151 = vlog2.f32 %v100_v31 }
  0x2c   :  { %153 = vlog2.f32 %v101_v32 }
  0x36   :  { %v148_v38 = vpop.eup %147 }
  0x37   :  { %v150_v40 = vpop.eup %149  ;;  %v103_v42 = vmul.f32 0.6931472, %v148_v38 }
  0x38   :  { %v152_v43 = vpop.eup %151  ;;  %v105_v45 = vmul.f32 0.6931472, %v150_v40 }
  0x39   :  { %v154_v46 = vpop.eup %153  ;;  %v107_v47 = vmul.f32 0.6931472, %v152_v43  ;;  %v110_v48 = vmul.f32 %v103_v42, %v78_v37 }
  0x3a   :  { %v109_v49 = vmul.f32 0.6931472, %v154_v46  ;;  %v111_v50 = vmul.f32 %v105_v45, %v79_v39 }
  0x3b   :  { %v112_v51 = vmul.f32 %v107_v47, %v80_v41  ;;  %v114_v52 = vsub.f32 0.0, %v110_v48 }
  0x3c   :  { %v113_v53 = vmul.f32 %v109_v49, %v81_v44  ;;  %v115_v54 = vsub.f32 0.0, %v111_v50 }
  0x3d   :  { %v116_v55 = vsub.f32 0.0, %v112_v51 }
  0x3e   :  { %v117_v56 = vsub.f32 0.0, %v113_v53  ;;  %v118_v57 = vadd.f32 %v115_v54, %v114_v52 }
  0x40   :  { %v119_v58 = vadd.f32 %v118_v57, %v116_v55 }
  0x42   :  { %v120_v59 = vadd.f32 %v119_v58, %v117_v56 }
  0x44   :  { %121 = vst [vmem:[#allocation7] sm:$0xff] %v120_v59 }
  0x45   :  { %206 = shalt.err (!%p203_p0)
}
  0x46   :  { %131 = dma.vmem_to_hbm [thread:$0]  %s129_s1, 128, %s252_s2, [#allocation4]  }
  0x47   :  { %219 = dma.done.wait [#allocation4], 128  }
  0x48   :  { %220 = vsyncadd [#allocation4], 4294967168 }
  0x49   :  { %135 = vsyncpa [#allocation3], 1 }
  0x4a   :  { %136 = vsyncpa [#allocation6], 1 }
  0x4b   :  { %137 = vsyncpa [#allocation4], 1 }

</bundles_post_ra>
